<compile_context>
chip_gen: v6e
topology: v6e:2x2x1
jax: 0.10.0
libtpu: 0.0.40
codegen_flags: <defaults>
</compile_context>

<pallas_src>
import functools

import jax
import jax.numpy as jnp
from jax.experimental import pallas as pl
from jax.experimental.pallas import tpu as pltpu


# ----------------------------------------------------------------------------
# Fused SE kernel: one grid step owns `bt` batch elements.
#   x_ref : (bt, C, HW)  NCHW activations, spatial flattened onto lanes
#   w1_ref: (S, C)       fc1 weight (native PyTorch layout)
#   b1_ref: (S, 1)
#   w2_ref: (C, S)       fc2 weight (native PyTorch layout)
#   b2_ref: (C, 1)
#   o_ref : (bt, C, HW)  scale * x
# ----------------------------------------------------------------------------
def _se_kernel(x_ref, w1_ref, b1_ref, w2_ref, b2_ref, o_ref, *, inv_hw, bt):
    w1 = w1_ref[...]          # (S, C)  — hoisted out of the batch loop
    w2 = w2_ref[...]          # (C, S)
    b1 = b1_ref[...]          # (S, 1)
    b2 = b2_ref[...]          # (C, 1)
    for b in range(bt):       # static unroll, bt <= 8
        # Squeeze: AdaptiveAvgPool2d(1) == mean over the spatial (lane) axis.
        pooled = jnp.sum(x_ref[b], axis=-1, keepdims=True) * inv_hw        # (C, 1)
        # fc1 (1x1 conv) + ReLU: (S, C) @ (C, 1) -> (S, 1)
        s = jnp.dot(w1, pooled, preferred_element_type=jnp.float32) + b1
        s = jnp.maximum(s, 0.0)
        # fc2 (1x1 conv) + Sigmoid: (C, S) @ (S, 1) -> (C, 1)
        g = jnp.dot(w2, s, preferred_element_type=jnp.float32) + b2
        g = jax.nn.sigmoid(g)
        # Excite: re-stream x from VMEM for the rescale (low vreg pressure);
        # (C, 1) broadcasts over the lane (spatial) axis.
        o_ref[b] = (x_ref[b] * g).astype(o_ref.dtype)


def _pick_bt(B, C, HW):
    """Batch elements per grid step: amortize the ~0.35us/step overhead while
    keeping >=2 steps (v7x has 2 TensorCores) and a modest per-step block
    (~2 MiB of x -> ~8 MiB with double-buffered in+out; fits v5e's 16 MiB
    scoped-VMEM default and v7x's 64 MiB physical VMEM)."""
    per_batch_bytes = C * HW * 4
    cap = max(1, min(8, (2 * 1024 * 1024) // max(per_batch_bytes, 1)))
    min_steps = 2 if B >= 2 else 1
    best = 1
    for cand in range(1, min(cap, B) + 1):
        if B % cand == 0 and B // cand >= min_steps:
            best = cand
    return best


def squeeze_excitation(x_nchw, w1, b1, w2, b2):
    """x_nchw: (B, C, H, W) f32.  w1: (S, C, 1, 1), b1: (S,), w2: (C, S, 1, 1), b2: (C,)."""
    B, C, H, W = x_nchw.shape
    S = w1.shape[0]
    HW = H * W

    # NCHW consumed directly: collapsing H,W is a free contiguous reshape
    # (no transpose, no extra HBM pass).  Weights keep their PyTorch layout;
    # only the trailing 1x1 conv dims are dropped (tiny arrays, negligible).
    x = x_nchw.reshape(B, C, HW)
    w1m = w1.reshape(S, C)
    w2m = w2.reshape(C, S)
    b1c = b1.reshape(S, 1)
    b2c = b2.reshape(C, 1)

    bt = _pick_bt(B, C, HW)
    grid = (B // bt,)

    # Perf note: stores are lane-dense only when HW is a multiple of 128
    # (true here: 16*16 = 256); otherwise they become masked (correct, slower).
    # TODO(synk): if a per-step block would exceed ~8 MiB (large H*W or C),
    # switch to a two-pass scheme (pooled-reduce pass, then HW-tiled rescale
    # pass) instead of growing the whole-slab block.
    out = pl.pallas_call(
        functools.partial(_se_kernel, inv_hw=1.0 / HW, bt=bt),
        out_shape=jax.ShapeDtypeStruct((B, C, HW), x.dtype),
        grid=grid,
        in_specs=[
            pl.BlockSpec((bt, C, HW), lambda i: (i, 0, 0)),   # bt batch slabs / step
            pl.BlockSpec((S, C), lambda i: (0, 0)),           # weights/biases: resident
            pl.BlockSpec((S, 1), lambda i: (0, 0)),
            pl.BlockSpec((C, S), lambda i: (0, 0)),
            pl.BlockSpec((C, 1), lambda i: (0, 0)),
        ],
        out_specs=pl.BlockSpec((bt, C, HW), lambda i: (i, 0, 0)),
        compiler_params=pltpu.CompilerParams(
            dimension_semantics=("parallel",)),               # shard steps across TCs
    )(x, w1m, b1c, w2m, b2c)

    return out.reshape(B, C, H, W)


# ----------------------------------------------------------------------------
# Plain-JAX reference (same math, for a correctness check).
# ----------------------------------------------------------------------------
def _se_reference(x, w1, b1, w2, b2):
    S = w1.shape[0]
    C = w1.shape[1]
    pooled = jnp.mean(x, axis=(2, 3))                                   # (B, C)
    s = jnp.maximum(pooled @ jnp.transpose(w1.reshape(S, C)) + b1, 0.0)
    g = jax.nn.sigmoid(s @ jnp.transpose(w2.reshape(C, S)) + b2)        # (B, C)
    return x * g[:, :, None, None]


if __name__ == "__main__":
    key = jax.random.PRNGKey(0)
    k_x, k_w1, k_b1, k_w2, k_b2 = jax.random.split(key, 5)

    # Small but dense shapes: C = 128 sublane-dense, H*W = 256 lane-dense.
    B, C, H, W = 2, 128, 16, 16
    S = 32                                              # squeeze_channels

    x = jax.random.normal(k_x, (B, C, H, W), jnp.float32)
    w1 = 0.05 * jax.random.normal(k_w1, (S, C, 1, 1), jnp.float32)      # fc1
    b1 = 0.05 * jax.random.normal(k_b1, (S,), jnp.float32)
    w2 = 0.05 * jax.random.normal(k_w2, (C, S, 1, 1), jnp.float32)      # fc2
    b2 = 0.05 * jax.random.normal(k_b2, (C,), jnp.float32)

    fwd = jax.jit(squeeze_excitation)
    out = jax.block_until_ready(fwd(x, w1, b1, w2, b2))

    assert out.shape == (B, C, H, W), out.shape
    assert bool(jnp.all(jnp.isfinite(out)))

    ref = _se_reference(x, w1, b1, w2, b2)
    assert bool(jnp.allclose(out, ref, rtol=1e-5, atol=1e-5)), (
        float(jnp.max(jnp.abs(out - ref))))

    print("KERNEL_OK")
</pallas_src>

<mosaic_0001>
module attributes {stable_mosaic.version = 11 : i64} {
  func.func @_se_kernel(%arg0: i32, %arg1: memref<1x128x256xf32, #tpu.memory_space<vmem>>, %arg2: memref<32x128xf32, #tpu.memory_space<vmem>>, %arg3: memref<32x1xf32, #tpu.memory_space<vmem>>, %arg4: memref<128x32xf32, #tpu.memory_space<vmem>>, %arg5: memref<128x1xf32, #tpu.memory_space<vmem>>, %arg6: memref<1x128x256xf32, #tpu.memory_space<vmem>>) attributes {dimension_semantics = [#tpu.dimension_semantics<parallel>], iteration_bounds = array<i64: 2>, scalar_prefetch = 0 : i64, scratch_operands = 0 : i64, tpu.core_type = #tpu.core_type<tc>, window_params = [{transform_indices = @transform_0, window_bounds = array<i64: 1, 128, 256>}, {pipeline_mode = #tpu.pipeline_mode<synchronous>, transform_indices = @transform_1, window_bounds = array<i64: 32, 128>}, {pipeline_mode = #tpu.pipeline_mode<synchronous>, transform_indices = @transform_2, window_bounds = array<i64: 32, 1>}, {pipeline_mode = #tpu.pipeline_mode<synchronous>, transform_indices = @transform_3, window_bounds = array<i64: 128, 32>}, {pipeline_mode = #tpu.pipeline_mode<synchronous>, transform_indices = @transform_4, window_bounds = array<i64: 128, 1>}, {transform_indices = @transform_5, window_bounds = array<i64: 1, 128, 256>}]} {
    %c0 = arith.constant 0 : index
    %c0_0 = arith.constant 0 : index
    %0 = vector.load %arg2[%c0, %c0_0] : memref<32x128xf32, #tpu.memory_space<vmem>>, vector<32x128xf32>
    %c0_1 = arith.constant 0 : index
    %c0_2 = arith.constant 0 : index
    %1 = vector.load %arg4[%c0_1, %c0_2] : memref<128x32xf32, #tpu.memory_space<vmem>>, vector<128x32xf32>
    %c0_3 = arith.constant 0 : index
    %c0_4 = arith.constant 0 : index
    %2 = vector.load %arg3[%c0_3, %c0_4] : memref<32x1xf32, #tpu.memory_space<vmem>>, vector<32x1xf32>
    %c0_5 = arith.constant 0 : index
    %c0_6 = arith.constant 0 : index
    %3 = vector.load %arg5[%c0_5, %c0_6] : memref<128x1xf32, #tpu.memory_space<vmem>>, vector<128x1xf32>
    %c0_7 = arith.constant 0 : index
    %c0_8 = arith.constant 0 : index
    %c0_9 = arith.constant 0 : index
    %4 = vector.load %arg1[%c0_7, %c0_8, %c0_9] : memref<1x128x256xf32, #tpu.memory_space<vmem>>, vector<1x128x256xf32>
    %5 = vector.shape_cast %4 : vector<1x128x256xf32> to vector<128x256xf32>
    %cst = arith.constant dense<0.000000e+00> : vector<128xf32>
    %6 = vector.multi_reduction <add>, %5, %cst [1] : vector<128x256xf32> to vector<128xf32>
    %7 = vector.shape_cast %6 : vector<128xf32> to vector<128x1xf32>
    %cst_10 = arith.constant 3.906250e-03 : f32
    %8 = vector.broadcast %cst_10 : f32 to vector<128x1xf32>
    %9 = arith.mulf %7, %8 : vector<128x1xf32>
    %cst_11 = arith.constant dense<0.000000e+00> : vector<32x1xf32>
    %10 = tpu.matmul %0, %9, %cst_11 {dimension_numbers = #tpu.dot_dimension_numbers<[1], [0], [0], [1], [0, 0, 1, 1], [], []>} : vector<32x128xf32>, vector<128x1xf32>, vector<32x1xf32> -> vector<32x1xf32>
    %11 = arith.addf %10, %2 : vector<32x1xf32>
    %cst_12 = arith.constant 0.000000e+00 : f32
    %12 = vector.broadcast %cst_12 : f32 to vector<32x1xf32>
    %13 = arith.maximumf %11, %12 : vector<32x1xf32>
    %cst_13 = arith.constant dense<0.000000e+00> : vector<128x1xf32>
    %14 = tpu.matmul %1, %13, %cst_13 {dimension_numbers = #tpu.dot_dimension_numbers<[1], [0], [0], [1], [0, 0, 1, 1], [], []>} : vector<128x32xf32>, vector<32x1xf32>, vector<128x1xf32> -> vector<128x1xf32>
    %15 = arith.addf %14, %3 : vector<128x1xf32>
    %16 = arith.negf %15 : vector<128x1xf32>
    %17 = math.exp %16 : vector<128x1xf32>
    %cst_14 = arith.constant 1.000000e+00 : f32
    %18 = vector.broadcast %cst_14 : f32 to vector<128x1xf32>
    %19 = arith.addf %18, %17 : vector<128x1xf32>
    %20 = arith.divf %18, %19 : vector<128x1xf32>
    %c0_15 = arith.constant 0 : index
    %c0_16 = arith.constant 0 : index
    %c0_17 = arith.constant 0 : index
    %21 = vector.load %arg1[%c0_15, %c0_16, %c0_17] : memref<1x128x256xf32, #tpu.memory_space<vmem>>, vector<1x128x256xf32>
    %22 = vector.shape_cast %21 : vector<1x128x256xf32> to vector<128x256xf32>
    %23 = vector.broadcast %20 : vector<128x1xf32> to vector<128x256xf32>
    %24 = arith.mulf %22, %23 : vector<128x256xf32>
    %c0_18 = arith.constant 0 : index
    %c0_19 = arith.constant 0 : index
    %c0_20 = arith.constant 0 : index
    %25 = vector.load %arg6[%c0_18, %c0_19, %c0_20] : memref<1x128x256xf32, #tpu.memory_space<vmem>>, vector<1x128x256xf32>
    %26 = vector.shape_cast %25 : vector<1x128x256xf32> to vector<128x256xf32>
    %27 = vector.shape_cast %24 : vector<128x256xf32> to vector<1x128x256xf32>
    tpu.vector_store %arg6[%c0_18, %c0_19, %c0_20], %27 {strides = array<i32>} : memref<1x128x256xf32, #tpu.memory_space<vmem>>, vector<1x128x256xf32>,
    return
  }
  func.func @transform_0(%arg0: i32) -> (i32, i32, i32) {
    %c0_i32 = arith.constant 0 : i32
    %c0_i32_0 = arith.constant 0 : i32
    %c0_i32_1 = arith.constant 0 : i32
    return %arg0, %c0_i32, %c0_i32_0 : i32, i32, i32
  }
  func.func @transform_1(%arg0: i32) -> (i32, i32) {
    %c0_i32 = arith.constant 0 : i32
    %c0_i32_0 = arith.constant 0 : i32
    %c0_i32_1 = arith.constant 0 : i32
    return %c0_i32, %c0_i32_0 : i32, i32
  }
  func.func @transform_2(%arg0: i32) -> (i32, i32) {
    %c0_i32 = arith.constant 0 : i32
    %c0_i32_0 = arith.constant 0 : i32
    %c0_i32_1 = arith.constant 0 : i32
    return %c0_i32, %c0_i32_0 : i32, i32
  }
  func.func @transform_3(%arg0: i32) -> (i32, i32) {
    %c0_i32 = arith.constant 0 : i32
    %c0_i32_0 = arith.constant 0 : i32
    %c0_i32_1 = arith.constant 0 : i32
    return %c0_i32, %c0_i32_0 : i32, i32
  }
  func.func @transform_4(%arg0: i32) -> (i32, i32) {
    %c0_i32 = arith.constant 0 : i32
    %c0_i32_0 = arith.constant 0 : i32
    %c0_i32_1 = arith.constant 0 : i32
    return %c0_i32, %c0_i32_0 : i32, i32
  }
  func.func @transform_5(%arg0: i32) -> (i32, i32, i32) {
    %c0_i32 = arith.constant 0 : i32
    %c0_i32_0 = arith.constant 0 : i32
    %c0_i32_1 = arith.constant 0 : i32
    return %arg0, %c0_i32, %c0_i32_0 : i32, i32, i32
  }
}

</mosaic_0001>

<bundles_post_ra>
// kernel: squeeze_excitation.1
= control target key start
LH: loop header
LB: loop body
LE: loop exit
PB: predicated region body
PF: predicated region fallthrough
CT: control target
= control target key end

     0   :  { %s1208_s18 = smov 0   ;;  %s1564_s0 = inlined_call_operand.vmem [shape: f32[2,128,256], index: 0, kind: input, shape index: {}]   ;;  %s1565_s1 = inlined_call_operand.vmem [shape: f32[32,128], index: 1, kind: input, shape index: {}]   ;;  %s1566_s2 = inlined_call_operand.vmem [shape: f32[32,1], index: 2, kind: input, shape index: {}]   ;;  %s1567_s3 = inlined_call_operand.vmem [shape: f32[128,32], index: 3, kind: input, shape index: {}]   ;;  %s1568_s4 = inlined_call_operand.vmem [shape: f32[128,1], index: 4, kind: input, shape index: {}]   ;;  %s1569_s5 = inlined_call_operand.vmem [shape: f32[2,128,256], index: 5, kind: output, shape index: {}]  }
   0x1 LB: > { %s939_s19 = sadd.s32 4294967295, %s1175_s18   ;;  %p943_p0 = scmp.ge.s32.totalorder %s1175_s18, 1  ;;  %s1175_s18 = sphi %s1208_s18, %s15_s18  }
   0x2   : > { %p187_p1 = scmp.lt.s32.totalorder %s1175_s18, 3 }
   0x4   : > { %p188_p2 = pnand %p943_p0, %p187_p1 }
   0x5   : > { %p215_p3 = scmp.lt.s32.totalorder (!%p188_p2), %s939_s19, 1 }
   0x6   : > { %191 = sbr.rel (%p188_p2) target bundleno = 794 (0x31a), region = 40 }
   0xb   : > { %s1571_s19 = smov (!%p215_p3, %s939_s19), 1  ;;  %v225_v48 = vld [vmem:[%s1565_s1] sm:$0xff]  ;;  %vm450_vm0 = vcmask 261120  }
   0xc   : > { %s982_s20 = sshll.u32 %s1571_s19, 8  ;;  %1056 = vmatprep.mubr.f32.mxu0 %v225_v48 }
   0xd   : > { %s1224_s23 = scalar_lea.vmem %s1564_s0, %s982_s20  ;;  %s1495_s15 = scalar_lea.vmem %s1569_s5, %s982_s20 }
   0xe   : > { %v1227_v0 = vld [vmem:[%s1224_s23 + $0xf0] sm:$0xff]  ;;  %v1230_v1 = vld [vmem:[%s1224_s23 + $0xf8] sm:$0xff]  ;;  %v1233_v2 = vld [vmem:[%s1224_s23 + $0xe0] sm:$0xff] }
   0xf   : > { %v342_v3 = vadd.f32 %v1230_v1, %v1227_v0  ;;  %v1238_v4 = vld [vmem:[%s1224_s23 + $0xe8] sm:$0xff]  ;;  %v1241_v5 = vld [vmem:[%s1224_s23 + $0xd0] sm:$0xff]  ;;  %v1244_v6 = vld [vmem:[%s1224_s23 + $0xd8] sm:$0xff] }
  0x10   : > { %v336_v7 = vadd.f32 %v1244_v6, %v1241_v5  ;;  %v1249_v8 = vld [vmem:[%s1224_s23 + $0xc0] sm:$0xff]  ;;  %v1252_v9 = vld [vmem:[%s1224_s23 + $0xc8] sm:$0xff]  ;;  %v339_v10 = vadd.f32 %v1238_v4, %v1233_v2  ;;  %v1259_v12 = vld [vmem:[%s1224_s23 + $0xb0] sm:$0xff] }
  0x11   : > { %343 = vadd.xlane.f32.xlu0 %v342_v3  ;;  %v333_v11 = vadd.f32 %v1252_v9, %v1249_v8  ;;  %v1262_v13 = vld [vmem:[%s1224_s23 + $0xb8] sm:$0xff]  ;;  %v1265_v14 = vld [vmem:[%s1224_s23 + $0xa0] sm:$0xff]  ;;  %v1268_v15 = vld [vmem:[%s1224_s23 + $0xa8] sm:$0xff] }
  0x12   : > { %337 = vadd.xlane.f32.xlu1 %v336_v7  ;;  %v330_v16 = vadd.f32 %v1262_v13, %v1259_v12  ;;  %v327_v17 = vadd.f32 %v1268_v15, %v1265_v14  ;;  %v1275_v18 = vld [vmem:[%s1224_s23 + $0x90] sm:$0xff]  ;;  %v1278_v19 = vld [vmem:[%s1224_s23 + $0x98] sm:$0xff]  ;;  %v1281_v20 = vld [vmem:[%s1224_s23 + $0x80] sm:$0xff] }
  0x13   : > { %v1284_v21 = vld [vmem:[%s1224_s23 + $0x88] sm:$0xff]  ;;  %v324_v22 = vadd.f32 %v1278_v19, %v1275_v18  ;;  %v1291_v24 = vld [vmem:[%s1224_s23 + $0x70] sm:$0xff]  ;;  %v1294_v25 = vld [vmem:[%s1224_s23 + $0x78] sm:$0xff] }
  0x14   : > { %v321_v23 = vadd.f32 %v1284_v21, %v1281_v20  ;;  %v1297_v26 = vld [vmem:[%s1224_s23 + $0x60] sm:$0xff]  ;;  %v1300_v27 = vld [vmem:[%s1224_s23 + $0x68] sm:$0xff]  ;;  %v318_v28 = vadd.f32 %v1294_v25, %v1291_v24  ;;  %v1307_v30 = vld [vmem:[%s1224_s23 + $0x50] sm:$0xff] }
  0x15   : > { %340 = vadd.xlane.f32.xlu0 %v339_v10  ;;  %v315_v29 = vadd.f32 %v1300_v27, %v1297_v26  ;;  %v1310_v31 = vld [vmem:[%s1224_s23 + $0x58] sm:$0xff]  ;;  %v1313_v32 = vld [vmem:[%s1224_s23 + $0x40] sm:$0xff]  ;;  %v1316_v33 = vld [vmem:[%s1224_s23 + $0x48] sm:$0xff] }
  0x16   : > { %334 = vadd.xlane.f32.xlu1 %v333_v11  ;;  %v312_v34 = vadd.f32 %v1310_v31, %v1307_v30  ;;  %v309_v35 = vadd.f32 %v1316_v33, %v1313_v32  ;;  %v1323_v36 = vld [vmem:[%s1224_s23 + $0x30] sm:$0xff]  ;;  %v1326_v37 = vld [vmem:[%s1224_s23 + $0x38] sm:$0xff]  ;;  %v1329_v38 = vld [vmem:[%s1224_s23 + $0x20] sm:$0xff] }
  0x17   : > { %v1332_v39 = vld [vmem:[%s1224_s23 + $0x28] sm:$0xff]  ;;  %v306_v40 = vadd.f32 %v1326_v37, %v1323_v36  ;;  %v1339_v42 = vld [vmem:[%s1224_s23 + $0x10] sm:$0xff]  ;;  %v1342_v43 = vld [vmem:[%s1224_s23 + $0x18] sm:$0xff] }
  0x18   : > { %v303_v41 = vadd.f32 %v1332_v39, %v1329_v38  ;;  %v1345_v44 = vld [vmem:[%s1224_s23] sm:$0xff]  ;;  %v1348_v45 = vld [vmem:[%s1224_s23 + $0x8] sm:$0xff]  ;;  %v300_v46 = vadd.f32 %v1342_v43, %v1339_v42 }
  0x19   : > { %331 = vadd.xlane.f32.xlu0 %v330_v16  ;;  %v297_v47 = vadd.f32 %v1348_v45, %v1345_v44 }
  0x1a   : > { %328 = vadd.xlane.f32.xlu1 %v327_v17 }
  0x1d   : > { %325 = vadd.xlane.f32.xlu0 %v324_v22 }
  0x1e   : > { %322 = vadd.xlane.f32.xlu1 %v321_v23 }
  0x21   : > { %319 = vadd.xlane.f32.xlu0 %v318_v28 }
  0x22   : > { %316 = vadd.xlane.f32.xlu1 %v315_v29 }
  0x25   : > { %313 = vadd.xlane.f32.xlu0 %v312_v34 }
  0x26   : > { %310 = vadd.xlane.f32.xlu1 %v309_v35 }
  0x29   : > { %307 = vadd.xlane.f32.xlu0 %v306_v40 }
  0x2a   : > { %304 = vadd.xlane.f32.xlu1 %v303_v41 }
  0x2d   : > { %301 = vadd.xlane.f32.xlu0 %v300_v46 }
  0x2e   : > { %298 = vadd.xlane.f32.xlu1 %v297_v47 }
  0x9a   : > { %v344_v49 = vpop.xlane.xlu0 %343 }
  0x9b   : > { %v360_v50 = vmul.f32 0.00390625, %v344_v49  ;;  %v338_v51 = vpop.xlane.xlu1 %337  ;;  %v226_v49 = vld [vmem:[%s1565_s1 + $0x8] sm:$0xff] }
  0x9c   : > { %v358_v55 = vmul.f32 0.00390625, %v338_v51  ;;  %v228_v51 = vld [vmem:[%s1565_s1 + $0x18] sm:$0xff] }
  0x9d   : > { %1024 = vmatprep.subr.mxu0 %v360_v50 }
  0x9e   : > { %1025 = vmatpush3.msra.mxu0 %v360_v50  ;;  %v341_v52 = vpop.xlane.xlu0 %340  ;;  %v227_v50 = vld [vmem:[%s1565_s1 + $0x10] sm:$0xff] }
  0x9f   : > { %v359_v53 = vmul.f32 0.00390625, %v341_v52  ;;  %v335_v54 = vpop.xlane.xlu1 %334  ;;  %v229_v52 = vld [vmem:[%s1567_s3] sm:$0xff] }
  0xa0   : > { %v357_v56 = vmul.f32 0.00390625, %v335_v54  ;;  %1070 = vmatprep.mubr.msk.f32.mxu1 %vm450_vm0, %v229_v52  ;;  %v1177_v52 = vmov 0  }
  0xa1   : > { %1026 = vmatprep.subr.mxu0 %v359_v53  ;;  %1103 = vset.pattern.permute.xlu1 %v1177_v52 }
  0xa2   : > { %1027 = vmatpush3.msra.mxu0 %v359_v53  ;;  %v332_v57 = vpop.xlane.xlu0 %331  ;;  %1104 = vset.pattern.permute.xlu0 %v1177_v52 }
  0xa3   : > { %1028 = vmatprep.subr.mxu0 %v358_v55  ;;  %v356_v58 = vmul.f32 0.00390625, %v332_v57  ;;  %v329_v59 = vpop.xlane.xlu1 %328 }
  0xa4   : > { %1029 = vmatpush3.msra.mxu0 %v358_v55  ;;  %v355_v60 = vmul.f32 0.00390625, %v329_v59  ;;  %v248_v55 = vld [vmem:[%s1566_s2 + $0x18] sm:$0xff] }
  0xa5   : > { %1030 = vmatprep.subr.mxu0 %v357_v56 }
  0xa6   : > { %1031 = vmatpush3.msra.mxu0 %v357_v56  ;;  %v326_v61 = vpop.xlane.xlu0 %325  ;;  %v246_v56 = vld [vmem:[%s1566_s2 + $0x8] sm:$0xff] }
  0xa7   : > { %1032 = vmatprep.subr.mxu0 %v356_v58  ;;  %v354_v62 = vmul.f32 0.00390625, %v326_v61  ;;  %v323_v63 = vpop.xlane.xlu1 %322 }
  0xa8   : > { %1033 = vmatpush3.msra.mxu0 %v356_v58  ;;  %v353_v3 = vmul.f32 0.00390625, %v323_v63  ;;  %v247_v58 = vld [vmem:[%s1566_s2 + $0x10] sm:$0xff] }
  0xa9   : > { %1034 = vmatprep.subr.mxu0 %v355_v60 }
  0xaa   : > { %1035 = vmatpush3.msra.mxu0 %v355_v60  ;;  %v320_v7 = vpop.xlane.xlu0 %319  ;;  %v245_v60 = vld [vmem:[%s1566_s2] sm:$0xff] }
  0xab   : > { %1036 = vmatprep.subr.mxu0 %v354_v62  ;;  %v352_v10 = vmul.f32 0.00390625, %v320_v7  ;;  %v317_v11 = vpop.xlane.xlu1 %316 }
  0xac   : > { %1037 = vmatpush3.msra.mxu0 %v354_v62  ;;  %v351_v16 = vmul.f32 0.00390625, %v317_v11 }
  0xad   : > { %1038 = vmatprep.subr.mxu0 %v353_v3 }
  0xae   : > { %1039 = vmatpush3.msra.mxu0 %v353_v3  ;;  %v314_v17 = vpop.xlane.xlu0 %313 }
  0xaf   : > { %1040 = vmatprep.subr.mxu0 %v352_v10  ;;  %v350_v22 = vmul.f32 0.00390625, %v314_v17  ;;  %v311_v23 = vpop.xlane.xlu1 %310  ;;  %v230_v17 = vld [vmem:[%s1567_s3 + $0x8] sm:$0xff] }
  0xb0   : > { %1041 = vmatpush3.msra.mxu0 %v352_v10  ;;  %v349_v28 = vmul.f32 0.00390625, %v311_v23  ;;  %v232_v23 = vld [vmem:[%s1567_s3 + $0x18] sm:$0xff] }
  0xb1   : > { %1042 = vmatprep.subr.mxu0 %v351_v16 }
  0xb2   : > { %1043 = vmatpush3.msra.mxu0 %v351_v16  ;;  %v308_v29 = vpop.xlane.xlu0 %307 }
  0xb3   : > { %1044 = vmatprep.subr.mxu0 %v350_v22  ;;  %v348_v34 = vmul.f32 0.00390625, %v308_v29  ;;  %v305_v35 = vpop.xlane.xlu1 %304  ;;  %v234_v29 = vld [vmem:[%s1567_s3 + $0x28] sm:$0xff] }
  0xb4   : > { %1045 = vmatpush3.msra.mxu0 %v350_v22  ;;  %v347_v40 = vmul.f32 0.00390625, %v305_v35  ;;  %v231_v22 = vld [vmem:[%s1567_s3 + $0x10] sm:$0xff]  ;;  %v236_v35 = vld [vmem:[%s1567_s3 + $0x38] sm:$0xff] }
  0xb5   : > { %1046 = vmatprep.subr.mxu0 %v349_v28 }
  0xb6   : > { %1047 = vmatpush3.msra.mxu0 %v349_v28  ;;  %v302_v41 = vpop.xlane.xlu0 %301  ;;  %v233_v28 = vld [vmem:[%s1567_s3 + $0x20] sm:$0xff] }
  0xb7   : > { %1048 = vmatprep.subr.mxu0 %v348_v34  ;;  %v346_v46 = vmul.f32 0.00390625, %v302_v41  ;;  %v299_v47 = vpop.xlane.xlu1 %298  ;;  %v238_v41 = vld [vmem:[%s1567_s3 + $0x48] sm:$0xff] }
  0xb8   : > { %1049 = vmatpush3.msra.mxu0 %v348_v34  ;;  %v345_v48 = vmul.f32 0.00390625, %v299_v47  ;;  %v235_v34 = vld [vmem:[%s1567_s3 + $0x30] sm:$0xff]  ;;  %v240_v47 = vld [vmem:[%s1567_s3 + $0x58] sm:$0xff] }
  0xb9   : > { %1050 = vmatprep.subr.mxu0 %v347_v40 }
  0xba   : > { %1051 = vmatpush3.msra.mxu0 %v347_v40  ;;  %v237_v40 = vld [vmem:[%s1567_s3 + $0x40] sm:$0xff] }
  0xbb   : > { %1052 = vmatprep.subr.mxu0 %v346_v46 }
  0xbc   : > { %1053 = vmatpush3.msra.mxu0 %v346_v46  ;;  %v239_v46 = vld [vmem:[%s1567_s3 + $0x50] sm:$0xff] }
  0xbd   : > { %1054 = vmatprep.subr.mxu0 %v345_v48 }
  0xbe   : > { %1055 = vmatpush3.msra.mxu0 %v345_v48  ;;  %v241_v48 = vld [vmem:[%s1567_s3 + $0x60] sm:$0xff] }
  0xbf   : > { %1057 = vmatmul.mubr.f32.vlgmr.msra.gmra.mxu0 %v226_v49  ;;  %v242_v49 = vld [vmem:[%s1567_s3 + $0x68] sm:$0xff] }
  0xc0   : > { %1059 = vmatprep.mubr.f32.mxu0 %v227_v50  ;;  %v243_v50 = vld [vmem:[%s1567_s3 + $0x70] sm:$0xff] }
  0xc3   : > { %1060 = vmatmul.mubr.f32.gmra.mxu0 %v228_v51  ;;  %v244_v51 = vld [vmem:[%s1567_s3 + $0x78] sm:$0xff] }
 0x17f   : > { %v1058_v53 = vpop.f32.mrf.mxu0 }
 0x180   : > { %v433_v62 = vadd.f32 %v1058_v53, %v246_v56  ;;  %v250_v53 = vld [vmem:[%s1568_s4 + $0x8] sm:$0xff] }
 0x181   : > { %v427_v54 = vpop.f32.mrf.mxu0 }
 0x182   : > { %v428_v7 = vadd.f32 %v427_v54, %v245_v60  ;;  %v447_v11 = vmax.f32 %v433_v62, 0.0  ;;  %v251_v62 = vld [vmem:[%s1568_s4 + $0x10] sm:$0xff] }
 0x183   : > { %v1061_v57 = vpop.f32.mrf.mxu0 }
 0x184   : > { %v443_v59 = vadd.f32 %v1061_v57, %v248_v55  ;;  %v446_v16 = vmax.f32 %v428_v7, 0.0  ;;  %v249_v55 = vld [vmem:[%s1568_s4] sm:$0xff] }
 0x185   : > { %v437_v61 = vpop.f32.mrf.mxu0 }
 0x186   : > { %v449_v63 = vmax.f32 %v443_v59, 0.0  ;;  %v438_v3 = vadd.f32 %v437_v61, %v247_v58  ;;  %v252_v58 = vld [vmem:[%s1568_s4 + $0x18] sm:$0xff] }
 0x188   : > { %v448_v10 = vmax.f32 %v438_v3, 0.0  ;;  %1062 = vmatprep.subr.mxu1 %v449_v63 }
 0x189   : > { %1063 = vmatpush3.msra.mxu1 %v449_v63 }
 0x18a   : > { %1064 = vmatprep.subr.mxu1 %v448_v10 }
 0x18b   : > { %1065 = vmatpush3.msra.mxu1 %v448_v10  ;;  %v254_v10 = vld [vmem:[%s1568_s4 + $0x28] sm:$0xff] }
 0x18c   : > { %1066 = vmatprep.subr.mxu1 %v447_v11 }
 0x18d   : > { %1067 = vmatpush3.msra.mxu1 %v447_v11 }
 0x18e   : > { %1068 = vmatprep.subr.mxu1 %v446_v16 }
 0x18f   : > { %1069 = vmatpush3.msra.mxu1 %v446_v16 }
 0x190   : > { %1071 = vmatmul.mubr.msk.f32.vlgmr.msra.gmra.mxu1 %vm450_vm0, %v230_v17 }
 0x191   : > { %1073 = vmatprep.mubr.msk.f32.mxu1 %vm450_vm0, %v231_v22  ;;  %v253_v22 = vld [vmem:[%s1568_s4 + $0x20] sm:$0xff] }
 0x194   : > { %1074 = vmatmul.mubr.msk.f32.gmra.mxu1 %vm450_vm0, %v232_v23 }
 0x195   : > { %1076 = vmatprep.mubr.msk.f32.mxu1 %vm450_vm0, %v233_v28 }
 0x198   : > { %1077 = vmatmul.mubr.msk.f32.gmra.mxu1 %vm450_vm0, %v234_v29 }
 0x199   : > { %1079 = vmatprep.mubr.msk.f32.mxu1 %vm450_vm0, %v235_v34  ;;  %v256_v34 = vld [vmem:[%s1568_s4 + $0x38] sm:$0xff] }
 0x19c   : > { %1080 = vmatmul.mubr.msk.f32.gmra.mxu1 %vm450_vm0, %v236_v35 }
 0x19d   : > { %1082 = vmatprep.mubr.msk.f32.mxu1 %vm450_vm0, %v237_v40 }
 0x1a0   : > { %1083 = vmatmul.mubr.msk.f32.gmra.mxu1 %vm450_vm0, %v238_v41 }
 0x1a1   : > { %1085 = vmatprep.mubr.msk.f32.mxu1 %vm450_vm0, %v239_v46 }
 0x1a4   : > { %1086 = vmatmul.mubr.msk.f32.gmra.mxu1 %vm450_vm0, %v240_v47 }
 0x1a5   : > { %1088 = vmatprep.mubr.msk.f32.mxu1 %vm450_vm0, %v241_v48  ;;  %v255_v48 = vld [vmem:[%s1568_s4 + $0x30] sm:$0xff] }
 0x1a8   : > { %1089 = vmatmul.mubr.msk.f32.gmra.mxu1 %vm450_vm0, %v242_v49 }
 0x1a9   : > { %1091 = vmatprep.mubr.msk.f32.mxu1 %vm450_vm0, %v243_v50  ;;  %v258_v50 = vld [vmem:[%s1568_s4 + $0x48] sm:$0xff] }
 0x1ac   : > { %1092 = vmatmul.mubr.msk.f32.gmra.mxu1 %vm450_vm0, %v244_v51 }
 0x250   : > { %v1072_v54 = vpop.f32.mrf.mxu1 }
 0x251   : > { %v571_v56 = vadd.f32 %v1072_v54, %v250_v53 }
 0x252   : > { %v565_v57 = vpop.f32.mrf.mxu1 }
 0x253   : > { %v965_v59 = vmul.f32 -1.442695, %v571_v56  ;;  %v566_v60 = vadd.f32 %v565_v57, %v249_v55  ;;  %v257_v55 = vld [vmem:[%s1568_s4 + $0x40] sm:$0xff] }
 0x254   : > { %v1075_v61 = vpop.f32.mrf.mxu1 }
 0x255   : > { %1105 = vpow2.f32 %v965_v59  ;;  %v964_v63 = vmul.f32 -1.442695, %v566_v60  ;;  %v581_v3 = vadd.f32 %v1075_v61, %v252_v58  ;;  %v260_v58 = vld [vmem:[%s1568_s4 + $0x58] sm:$0xff] }
 0x256   : > { %v575_v7 = vpop.f32.mrf.mxu1 }
 0x257   : > { %1107 = vpow2.f32 %v964_v63  ;;  %v967_v11 = vmul.f32 -1.442695, %v581_v3  ;;  %v576_v16 = vadd.f32 %v575_v7, %v251_v62 }
 0x258   : > { %v1078_v17 = vpop.f32.mrf.mxu1 }
 0x259   : > { %1109 = vpow2.f32 %v967_v11  ;;  %v966_v23 = vmul.f32 -1.442695, %v576_v16  ;;  %v591_v28 = vadd.f32 %v1078_v17, %v254_v10  ;;  %v259_v17 = vld [vmem:[%s1568_s4 + $0x50] sm:$0xff] }
 0x25a   : > { %v585_v29 = vpop.f32.mrf.mxu1 }
 0x25b   : > { %1111 = vpow2.f32 %v966_v23  ;;  %v969_v35 = vmul.f32 -1.442695, %v591_v28  ;;  %v586_v40 = vadd.f32 %v585_v29, %v253_v22  ;;  %v262_v22 = vld [vmem:[%s1568_s4 + $0x68] sm:$0xff] }
 0x25c   : > { %v1081_v41 = vpop.f32.mrf.mxu1 }
 0x25d   : > { %1113 = vpow2.f32 %v969_v35  ;;  %v968_v46 = vmul.f32 -1.442695, %v586_v40  ;;  %v601_v47 = vadd.f32 %v1081_v41, %v256_v34 }
 0x25e   : > { %v595_v49 = vpop.f32.mrf.mxu1 }
 0x25f   : > { %v971_v51 = vmul.f32 -1.442695, %v601_v47  ;;  %1115 = vpow2.f32 %v968_v46  ;;  %v596_v52 = vadd.f32 %v595_v49, %v255_v48  ;;  %v261_v49 = vld [vmem:[%s1568_s4 + $0x60] sm:$0xff] }
 0x260   : > { %v1084_v53 = vpop.f32.mrf.mxu1 }
 0x261   : > { %v611_v54 = vadd.f32 %v1084_v53, %v258_v50  ;;  %1117 = vpow2.f32 %v971_v51  ;;  %v970_v62 = vmul.f32 -1.442695, %v596_v52  ;;  %v264_v50 = vld [vmem:[%s1568_s4 + $0x78] sm:$0xff] }
 0x262   : > { %v1106_v56 = vpop.eup %1105  ;;  %v605_v57 = vpop.f32.mrf.mxu1 }
 0x263   : > { %v693_v59 = vadd.f32 1.0, %v1106_v56  ;;  %v973_v60 = vmul.f32 -1.442695, %v611_v54  ;;  %v606_v63 = vadd.f32 %v605_v57, %v257_v55 }
 0x264   : > { %v1108_v61 = vpop.eup %1107  ;;  %v1087_v3 = vpop.f32.mrf.mxu1 }
 0x265   : > { %1119 = vrcp.f32 %v693_v59  ;;  %v692_v7 = vadd.f32 1.0, %v1108_v61  ;;  %v621_v10 = vadd.f32 %v1087_v3, %v260_v58  ;;  %v972_v34 = vmul.f32 -1.442695, %v606_v63  ;;  %v263_v59 = vld [vmem:[%s1568_s4 + $0x70] sm:$0xff] }
 0x266   : > { %v1110_v11 = vpop.eup %1109  ;;  %1121 = vpow2.f32 %v973_v60  ;;  %v615_v16 = vpop.f32.mrf.mxu1 }
 0x267   : > { %1123 = vrcp.f32 %v692_v7  ;;  %v695_v23 = vadd.f32 1.0, %v1110_v11  ;;  %v975_v28 = vmul.f32 -1.442695, %v621_v10  ;;  %v616_v41 = vadd.f32 %v615_v16, %v259_v17 }
 0x268   : > { %v1112_v29 = vpop.eup %1111  ;;  %1125 = vpow2.f32 %v970_v62  ;;  %v1090_v35 = vpop.f32.mrf.mxu1 }
 0x269   : > { %1127 = vrcp.f32 %v695_v23  ;;  %v694_v40 = vadd.f32 1.0, %v1112_v29  ;;  %v631_v46 = vadd.f32 %v1090_v35, %v262_v22  ;;  %v974_v55 = vmul.f32 -1.442695, %v616_v41 }
 0x26a   : > { %v1114_v47 = vpop.eup %1113  ;;  %1129 = vpow2.f32 %v975_v28  ;;  %v625_v48 = vpop.f32.mrf.mxu1 }
 0x26b   : > { %v697_v51 = vadd.f32 1.0, %v1114_v47  ;;  %v977_v52 = vmul.f32 -1.442695, %v631_v46  ;;  %1131 = vpow2.f32 %v972_v34  ;;  %v626_v56 = vadd.f32 %v625_v48, %v261_v49 }
 0x26c   : > { %v1093_v53 = vpop.f32.mrf.mxu1  ;;  %v1116_v54 = vpop.eup %1115  ;;  %1133 = vrcp.f32 %v694_v40 }
 0x26d   : > { %v641_v57 = vadd.f32 %v1093_v53, %v264_v50  ;;  %1135 = vpow2.f32 %v977_v52  ;;  %v696_v62 = vadd.f32 1.0, %v1116_v54  ;;  %v976_v63 = vmul.f32 -1.442695, %v626_v56 }
 0x26e   : > { %v635_v58 = vpop.f32.mrf.mxu1  ;;  %1137 = vrcp.f32 %v697_v51  ;;  %v1118_v61 = vpop.eup %1117 }
 0x26f   : > { %v979_v60 = vmul.f32 -1.442695, %v641_v57  ;;  %1139 = vpow2.f32 %v974_v55  ;;  %v636_v3 = vadd.f32 %v635_v58, %v263_v59  ;;  %v699_v11 = vadd.f32 1.0, %v1118_v61 }
 0x271   : > { %1141 = vpow2.f32 %v979_v60  ;;  %v978_v23 = vmul.f32 -1.442695, %v636_v3 }
 0x272   : > { %v1120_v7 = vpop.eup %1119  ;;  %1143 = vrcp.f32 %v696_v62 }
 0x273   : > { %v1122_v10 = vpop.eup %1121  ;;  %747 = vperm.xlu1 %1103, %v1120_v7   ;;  %1145 = vpow2.f32 %v976_v63 }
 0x274   : > { %v1124_v16 = vpop.eup %1123  ;;  %v701_v17 = vadd.f32 1.0, %v1122_v10 }
 0x275   : > { %v1126_v22 = vpop.eup %1125  ;;  %742 = vperm.xlu0 %1104, %v1124_v16  }
 0x276   : > { %v1128_v28 = vpop.eup %1127  ;;  %1147 = vrcp.f32 %v701_v17  ;;  %v698_v40 = vadd.f32 1.0, %v1126_v22 }
 0x277   : > { %v1130_v29 = vpop.eup %1129  ;;  %1149 = vrcp.f32 %v699_v11  ;;  %757 = vperm.xlu1 %1103, %v1128_v28  }
 0x278   : > { %v703_v34 = vadd.f32 1.0, %v1130_v29  ;;  %v1132_v35 = vpop.eup %1131  ;;  %1151 = vpow2.f32 %v978_v23 }
 0x279   : > { %v1134_v41 = vpop.eup %1133  ;;  %v700_v49 = vadd.f32 1.0, %v1132_v35 }
 0x27a   : > { %1153 = vrcp.f32 %v703_v34  ;;  %v1136_v46 = vpop.eup %1135 }
 0x27b   : > { %752 = vperm.xlu1 %1103, %v1134_v41   ;;  %v1138_v47 = vpop.eup %1137  ;;  %v705_v48 = vadd.f32 1.0, %v1136_v46  ;;  %1155 = vrcp.f32 %v698_v40 }
 0x27c   : > { %v1140_v50 = vpop.eup %1139 }
 0x27d   : > { %1157 = vrcp.f32 %v705_v48  ;;  %v702_v54 = vadd.f32 1.0, %v1140_v50 }
 0x27e   : > { %v1142_v51 = vpop.eup %1141  ;;  %1159 = vrcp.f32 %v700_v49 }
 0x27f   : > { %767 = vperm.xlu1 %1103, %v1138_v47   ;;  %v707_v52 = vadd.f32 1.0, %v1142_v51  ;;  %v1144_v53 = vpop.eup %1143 }
 0x280   : > { %v1146_v55 = vpop.eup %1145 }
 0x281   : > { %1161 = vrcp.f32 %v707_v52  ;;  %v704_v58 = vadd.f32 1.0, %v1146_v55 }
 0x282   : > { %1163 = vrcp.f32 %v702_v54 }
 0x283   : > { %v1148_v56 = vpop.eup %1147  ;;  %762 = vperm.xlu1 %1103, %v1144_v53   ;;  %1165 = vrcp.f32 %v704_v58 }
 0x284   : > { %v1150_v57 = vpop.eup %1149  ;;  %787 = vperm.xlu0 %1104, %v1148_v56  }
 0x285   : > { %v1152_v59 = vpop.eup %1151 }
 0x286   : > { %v706_v61 = vadd.f32 1.0, %v1152_v59 }
 0x287   : > { %v1154_v60 = vpop.eup %1153  ;;  %777 = vperm.xlu1 %1103, %v1150_v57  }
 0x288   : > { %797 = vperm.xlu0 %1104, %v1154_v60   ;;  %v1156_v62 = vpop.eup %1155  ;;  %1167 = vrcp.f32 %v706_v61 }
 0x28a   : > { %v1158_v63 = vpop.eup %1157 }
 0x28b   : > { %772 = vperm.xlu1 %1103, %v1156_v62   ;;  %v1160_v3 = vpop.eup %1159 }
 0x28c   : > { %807 = vperm.xlu0 %1104, %v1158_v63  }
 0x28e   : > { %v1162_v7 = vpop.eup %1161 }
 0x28f   : > { %782 = vperm.xlu1 %1103, %v1160_v3   ;;  %v1164_v10 = vpop.eup %1163 }
 0x290   : > { %817 = vperm.xlu0 %1104, %v1162_v7   ;;  %v1166_v11 = vpop.eup %1165 }
 0x293   : > { %792 = vperm.xlu1 %1103, %v1164_v10  }
 0x295   : > { %v1168_v16 = vpop.eup %1167 }
 0x297   : > { %802 = vperm.xlu1 %1103, %v1166_v11  }
 0x29b   : > { %812 = vperm.xlu1 %1103, %v1168_v16  }
 0x2ee   : > { %v748_v17 = vpop.permute.xlu1 %747 }
 0x2ef   : > { %v822_v22 = vmul.f32 %v748_v17, %v1339_v42  ;;  %v823_v23 = vmul.f32 %v748_v17, %v1342_v43 }
 0x2f0   : > { %v743_v28 = vpop.permute.xlu0 %742 }
 0x2f1   : > { %854 = vst [vmem:[%s1495_s15 + $0x10] sm:$0xff] %v822_v22  ;;  %855 = vst [vmem:[%s1495_s15 + $0x18] sm:$0xff] %v823_v23  ;;  %v820_v29 = vmul.f32 %v743_v28, %v1345_v44  ;;  %v821_v34 = vmul.f32 %v743_v28, %v1348_v45 }
 0x2f2   : > { %v758_v35 = vpop.permute.xlu1 %757 }
 0x2f3   : > { %852 = vst [vmem:[%s1495_s15] sm:$0xff] %v820_v29  ;;  %853 = vst [vmem:[%s1495_s15 + $0x8] sm:$0xff] %v821_v34  ;;  %v826_v40 = vmul.f32 %v758_v35, %v1323_v36  ;;  %v827_v42 = vmul.f32 %v758_v35, %v1326_v37 }
 0x2f5   : > { %858 = vst [vmem:[%s1495_s15 + $0x30] sm:$0xff] %v826_v40  ;;  %859 = vst [vmem:[%s1495_s15 + $0x38] sm:$0xff] %v827_v42 }
 0x2f6   : > { %v753_v43 = vpop.permute.xlu1 %752 }
 0x2f7   : > { %v824_v41 = vmul.f32 %v753_v43, %v1329_v38  ;;  %v825_v44 = vmul.f32 %v753_v43, %v1332_v39 }
 0x2f9   : > { %856 = vst [vmem:[%s1495_s15 + $0x20] sm:$0xff] %v824_v41  ;;  %857 = vst [vmem:[%s1495_s15 + $0x28] sm:$0xff] %v825_v44 }
 0x2fa   : > { %v768_v45 = vpop.permute.xlu1 %767 }
 0x2fb   : > { %v830_v46 = vmul.f32 %v768_v45, %v1307_v30  ;;  %v831_v36 = vmul.f32 %v768_v45, %v1310_v31 }
 0x2fd   : > { %862 = vst [vmem:[%s1495_s15 + $0x50] sm:$0xff] %v830_v46  ;;  %863 = vst [vmem:[%s1495_s15 + $0x58] sm:$0xff] %v831_v36 }
 0x2fe   : > { %v763_v37 = vpop.permute.xlu1 %762 }
 0x2ff   : > { %v828_v47 = vmul.f32 %v763_v37, %v1313_v32  ;;  %v829_v38 = vmul.f32 %v763_v37, %v1316_v33  ;;  %v788_v39 = vpop.permute.xlu0 %787 }
 0x300   : > { %v838_v48 = vmul.f32 %v788_v39, %v1275_v18  ;;  %v839_v49 = vmul.f32 %v788_v39, %v1278_v19 }
 0x301   : > { %860 = vst [vmem:[%s1495_s15 + $0x40] sm:$0xff] %v828_v47  ;;  %861 = vst [vmem:[%s1495_s15 + $0x48] sm:$0xff] %v829_v38 }
 0x302   : > { %870 = vst [vmem:[%s1495_s15 + $0x90] sm:$0xff] %v838_v48  ;;  %871 = vst [vmem:[%s1495_s15 + $0x98] sm:$0xff] %v839_v49  ;;  %v778_v30 = vpop.permute.xlu1 %777 }
 0x303   : > { %v834_v31 = vmul.f32 %v778_v30, %v1291_v24  ;;  %v835_v32 = vmul.f32 %v778_v30, %v1294_v25  ;;  %v798_v33 = vpop.permute.xlu0 %797 }
 0x304   : > { %v842_v50 = vmul.f32 %v798_v33, %v1259_v12  ;;  %v843_v18 = vmul.f32 %v798_v33, %v1262_v13 }
 0x305   : > { %866 = vst [vmem:[%s1495_s15 + $0x70] sm:$0xff] %v834_v31  ;;  %867 = vst [vmem:[%s1495_s15 + $0x78] sm:$0xff] %v835_v32 }
 0x306   : > { %874 = vst [vmem:[%s1495_s15 + $0xb0] sm:$0xff] %v842_v50  ;;  %875 = vst [vmem:[%s1495_s15 + $0xb8] sm:$0xff] %v843_v18  ;;  %v773_v19 = vpop.permute.xlu1 %772 }
 0x307   : > { %v832_v51 = vmul.f32 %v773_v19, %v1297_v26  ;;  %v833_v24 = vmul.f32 %v773_v19, %v1300_v27  ;;  %v808_v25 = vpop.permute.xlu0 %807 }
 0x308   : > { %v846_v52 = vmul.f32 %v808_v25, %v1241_v5  ;;  %v847_v12 = vmul.f32 %v808_v25, %v1244_v6 }
 0x309   : > { %864 = vst [vmem:[%s1495_s15 + $0x60] sm:$0xff] %v832_v51  ;;  %865 = vst [vmem:[%s1495_s15 + $0x68] sm:$0xff] %v833_v24 }
 0x30a   : > { %878 = vst [vmem:[%s1495_s15 + $0xd0] sm:$0xff] %v846_v52  ;;  %879 = vst [vmem:[%s1495_s15 + $0xd8] sm:$0xff] %v847_v12  ;;  %v783_v13 = vpop.permute.xlu1 %782 }
 0x30b   : > { %v836_v53 = vmul.f32 %v783_v13, %v1281_v20  ;;  %v837_v26 = vmul.f32 %v783_v13, %v1284_v21  ;;  %v818_v27 = vpop.permute.xlu0 %817 }
 0x30c   : > { %v850_v54 = vmul.f32 %v818_v27, %v1227_v0  ;;  %v851_v5 = vmul.f32 %v818_v27, %v1230_v1 }
 0x30d   : > { %868 = vst [vmem:[%s1495_s15 + $0x80] sm:$0xff] %v836_v53  ;;  %869 = vst [vmem:[%s1495_s15 + $0x88] sm:$0xff] %v837_v26 }
 0x30e   : > { %882 = vst [vmem:[%s1495_s15 + $0xf0] sm:$0xff] %v850_v54  ;;  %883 = vst [vmem:[%s1495_s15 + $0xf8] sm:$0xff] %v851_v5  ;;  %v793_v6 = vpop.permute.xlu1 %792 }
 0x30f   : > { %v840_v55 = vmul.f32 %v793_v6, %v1265_v14  ;;  %v841_v20 = vmul.f32 %v793_v6, %v1268_v15 }
 0x311   : > { %872 = vst [vmem:[%s1495_s15 + $0xa0] sm:$0xff] %v840_v55  ;;  %873 = vst [vmem:[%s1495_s15 + $0xa8] sm:$0xff] %v841_v20 }
 0x312   : > { %v803_v21 = vpop.permute.xlu1 %802 }
 0x313   : > { %v844_v56 = vmul.f32 %v803_v21, %v1249_v8  ;;  %v845_v0 = vmul.f32 %v803_v21, %v1252_v9 }
 0x315   : > { %876 = vst [vmem:[%s1495_s15 + $0xc0] sm:$0xff] %v844_v56  ;;  %877 = vst [vmem:[%s1495_s15 + $0xc8] sm:$0xff] %v845_v0 }
 0x316   : > { %v813_v1 = vpop.permute.xlu1 %812 }
 0x317   : > { %v848_v57 = vmul.f32 %v813_v1, %v1233_v2  ;;  %v849_v58 = vmul.f32 %v813_v1, %v1238_v4 }
 0x319   : > { %880 = vst [vmem:[%s1495_s15 + $0xe0] sm:$0xff] %v848_v57  ;;  %881 = vst [vmem:[%s1495_s15 + $0xe8] sm:$0xff] %v849_v58 }
 0x31a PF: > { %s15_s18 = sadd.s32 1, %s1175_s18  }
 0x31b   : > { %p12_p4 = scmp.ge.s32.totalorder %s15_s18, 4  }
 0x31d   :  { %14 = sbr.rel (!%p12_p4) target bundleno = 1 (0x1), region = 70 }

</bundles_post_ra>
